<compile_context>
chip_gen: v7x
topology: tpu7x:2x2x1
jax: 0.10.0
libtpu: 0.0.40
codegen_flags: <defaults>
</compile_context>

<pallas_src>
import jax
import jax.numpy as jnp
from jax.experimental import pallas as pl
from jax.experimental.pallas import tpu as pltpu


def _round_up(x, m):
    return (x + m - 1) // m * m


def _make_decoder_kernel(num_layers: int, batch: int, hid_pad: int):
    """Pallas kernel closed over static layer count / padded dims."""
    B, HP, L = batch, hid_pad, num_layers

    def kernel(tok_ref,        # SMEM (B,) int32 (scalar prefetch)
               emb_ref,        # VMEM (V, EP) f32
               hidden_ref,     # VMEM (L, B, HP) f32  (aliased with hid_out)
               *rest):
        layer_refs = rest[:3 * L]                      # (w_x, w_h, b) per layer
        wout_ref = rest[3 * L + 0]                     # (HP, VP) bf16
        bout_ref = rest[3 * L + 1]                     # (1, VP) f32
        pred_ref = rest[3 * L + 2]                     # (B, VP) f32
        hid_out_ref = rest[3 * L + 3]                  # (L, B, HP) f32
        x_buf = rest[3 * L + 4]                        # VMEM (B, EP) f32 scratch

        # ---- embedding row gather: dynamic sublane reads from VMEM table ----
        # (token ids are assumed in range; no DMA bounds check anymore)
        for i in range(B):
            x_buf[pl.ds(i, 1), :] = emb_ref[pl.ds(tok_ref[i], 1), :]
        x = jnp.maximum(x_buf[...], 0.0).astype(jnp.bfloat16)   # F.relu(embedding)

        # ---- stacked GRU cells (seq_len == 1), two MXU pushes per layer ------
        # gate column blocks (each 128-lane aligned): [r | z | W_in x | W_hn h]
        for l in range(L):
            wx_ref = layer_refs[3 * l + 0]
            wh_ref = layer_refs[3 * l + 1]
            b_ref = layer_refs[3 * l + 2]
            h_prev = hidden_ref[l]                     # (B, HP) f32

            g = (jnp.dot(x, wx_ref[...], preferred_element_type=jnp.float32)
                 + jnp.dot(h_prev.astype(jnp.bfloat16), wh_ref[...],
                           preferred_element_type=jnp.float32)
                 + b_ref[...])

            r = jax.nn.sigmoid(g[:, 0 * HP:1 * HP])    # 128-aligned lane slices
            z = jax.nn.sigmoid(g[:, 1 * HP:2 * HP])
            gin = g[:, 2 * HP:3 * HP]                  # W_in x + b_in  (pad = 0)
            ghn = g[:, 3 * HP:4 * HP]                  # W_hn h + b_hn  (pad = 0)
            n = jnp.tanh(gin + r * ghn)
            h_new = (1.0 - z) * n + z * h_prev         # pad lanes stay exactly 0

            hid_out_ref[l] = h_new
            x = h_new.astype(jnp.bfloat16)             # feeds next layer / output

        # ---- output projection + LogSoftmax(dim=1), lane-dense --------------
        logits = jnp.dot(x, wout_ref[...],
                         preferred_element_type=jnp.float32) + bout_ref[...]
        # padded vocab lanes carry bias -1e30 -> exp underflows to 0, lse exact
        m = jnp.max(logits, axis=-1, keepdims=True)
        s = logits - m
        lse = jnp.log(jnp.sum(jnp.exp(s), axis=-1, keepdims=True))
        pred_ref[...] = s - lse

    return kernel


def prepare_packed_params(params, *, output_dim, hidden_dim, embbed_dim, num_layers):
    """One-time host-side packing: transpose, gate-fuse, pad to 128 lanes,
    cast matmul weights to bf16 (biases and embedding stay f32)."""
    H, E, V = hidden_dim, embbed_dim, output_dim
    HP = _round_up(H, 128)
    EP = _round_up(E, 128)
    VP = _round_up(V, 128)

    emb_p = jnp.zeros((V, EP), jnp.float32).at[:, :E].set(params["embedding"])

    layers = []
    for l in range(num_layers):
        in_dim = E if l == 0 else H
        INP = EP if l == 0 else HP
        w_ih = params[f"w_ih_l{l}"]            # (3H, in_dim), gate order r, z, n
        w_hh = params[f"w_hh_l{l}"]            # (3H, H)
        b_ih = params[f"b_ih_l{l}"]            # (3H,)
        b_hh = params[f"b_hh_l{l}"]            # (3H,)

        # column blocks: [0]=r, [1]=z, [2]=W_in x (+b_in), [3]=W_hn h (+b_hn)
        w_x = jnp.zeros((INP, 4 * HP), jnp.float32)
        w_x = w_x.at[:in_dim, 0 * HP:0 * HP + H].set(w_ih[0 * H:1 * H].T)
        w_x = w_x.at[:in_dim, 1 * HP:1 * HP + H].set(w_ih[1 * H:2 * H].T)
        w_x = w_x.at[:in_dim, 2 * HP:2 * HP + H].set(w_ih[2 * H:3 * H].T)

        w_h = jnp.zeros((HP, 4 * HP), jnp.float32)
        w_h = w_h.at[:H, 0 * HP:0 * HP + H].set(w_hh[0 * H:1 * H].T)
        w_h = w_h.at[:H, 1 * HP:1 * HP + H].set(w_hh[1 * H:2 * H].T)
        w_h = w_h.at[:H, 3 * HP:3 * HP + H].set(w_hh[2 * H:3 * H].T)

        b = jnp.zeros((1, 4 * HP), jnp.float32)
        b = b.at[0, 0 * HP:0 * HP + H].set(b_ih[0 * H:1 * H] + b_hh[0 * H:1 * H])
        b = b.at[0, 1 * HP:1 * HP + H].set(b_ih[1 * H:2 * H] + b_hh[1 * H:2 * H])
        b = b.at[0, 2 * HP:2 * HP + H].set(b_ih[2 * H:3 * H])
        b = b.at[0, 3 * HP:3 * HP + H].set(b_hh[2 * H:3 * H])

        layers.append((w_x.astype(jnp.bfloat16), w_h.astype(jnp.bfloat16), b))

    w_out = (jnp.zeros((HP, VP), jnp.float32).at[:H, :V].set(params["w_out"].T)
             .astype(jnp.bfloat16))
    b_out = jnp.full((1, VP), -1e30, jnp.float32).at[0, :V].set(params["b_out"])

    return {"embedding": emb_p, "layers": layers, "w_out": w_out, "b_out": b_out,
            "dims": (V, H, E, VP, HP, EP, num_layers)}


def pad_hidden(hidden, packed):
    """(L, B, H) f32 -> padded (L, B, HP) f32, done once outside the decode loop."""
    _, H, _, _, HP, _, _ = packed["dims"]
    L, B, _ = hidden.shape
    return jnp.zeros((L, B, HP), jnp.float32).at[:, :, :H].set(hidden)


def unpad_hidden(hidden_p, packed):
    _, H, _, _, _, _, _ = packed["dims"]
    return hidden_p[:, :, :H]


def _vmem_limit_bytes(packed, batch):
    V, H, E, VP, HP, EP, L = packed["dims"]

    def nbytes(a):
        return a.size * a.dtype.itemsize

    total = nbytes(packed["embedding"]) + nbytes(packed["w_out"]) + nbytes(packed["b_out"])
    for w_x, w_h, b in packed["layers"]:
        total += nbytes(w_x) + nbytes(w_h) + nbytes(b)
    total += 2 * L * batch * HP * 4      # hidden in + hidden out
    total += batch * VP * 4              # log-prob output
    total += batch * EP * 4              # embedding scratch
    # 2x for default double-buffering of pipelined blocks, plus slack; clamped
    # so it stays within v7x's 64 MiB VMEM per TensorCore.
    return int(min(max(2 * total + (1 << 20), 8 * 1024 * 1024), 64 * 1024 * 1024))


def decoder_forward(tokens, hidden_p, packed):
    """tokens: int32 (B,); hidden_p: padded f32 (L, B, HP).
    Returns (log_probs (B, V), new padded hidden (L, B, HP))."""
    V, H, E, VP, HP, EP, L = packed["dims"]
    B = int(tokens.shape[0])

    inputs = [tokens.astype(jnp.int32), packed["embedding"], hidden_p]
    for (w_x, w_h, b) in packed["layers"]:
        inputs += [w_x, w_h, b]
    inputs += [packed["w_out"], packed["b_out"]]

    def _const_spec(shape):
        zeros = (0,) * len(shape)
        return pl.BlockSpec(shape, lambda i, tok, _z=zeros: _z)

    in_specs = [_const_spec(packed["embedding"].shape),        # embedding (VMEM)
                _const_spec((L, B, HP))]                       # hidden
    for (w_x, w_h, b) in packed["layers"]:
        in_specs += [_const_spec(w_x.shape), _const_spec(w_h.shape),
                     _const_spec(b.shape)]
    in_specs += [_const_spec(packed["w_out"].shape),
                 _const_spec(packed["b_out"].shape)]

    out_specs = (_const_spec((B, VP)), _const_spec((L, B, HP)))

    grid_spec = pltpu.PrefetchScalarGridSpec(
        num_scalar_prefetch=1,
        grid=(1,),
        in_specs=in_specs,
        out_specs=out_specs,
        scratch_shapes=[pltpu.VMEM((B, EP), jnp.float32)],
    )

    kernel = _make_decoder_kernel(L, B, HP)

    pred_p, hid_p = pl.pallas_call(
        kernel,
        out_shape=(jax.ShapeDtypeStruct((B, VP), jnp.float32),
                   jax.ShapeDtypeStruct((L, B, HP), jnp.float32)),
        grid_spec=grid_spec,
        # flat inputs: [tokens, embedding, hidden_p, ...] -> hidden_p (idx 2)
        # aliased onto the hidden output (output idx 1): in-place state update.
        input_output_aliases={2: 1},
        compiler_params=pltpu.CompilerParams(
            dimension_semantics=("arbitrary",),
            vmem_limit_bytes=_vmem_limit_bytes(packed, B)),
    )(*inputs)

    return pred_p[:, :V], hid_p


def decoder_reference(tokens, hidden, params, *, output_dim, hidden_dim,
                      embbed_dim, num_layers):
    """Pure-JAX f32 (HIGHEST precision) reference mirroring torch semantics."""
    H = hidden_dim
    HI = jax.lax.Precision.HIGHEST
    x = jnp.maximum(params["embedding"][tokens], 0.0)
    new_hidden = []
    for l in range(num_layers):
        h_prev = hidden[l]
        gi = jnp.dot(x, params[f"w_ih_l{l}"].T, precision=HI) + params[f"b_ih_l{l}"]
        gh = jnp.dot(h_prev, params[f"w_hh_l{l}"].T, precision=HI) + params[f"b_hh_l{l}"]
        r = jax.nn.sigmoid(gi[:, :H] + gh[:, :H])
        z = jax.nn.sigmoid(gi[:, H:2 * H] + gh[:, H:2 * H])
        n = jnp.tanh(gi[:, 2 * H:] + r * gh[:, 2 * H:])
        h_new = (1.0 - z) * n + z * h_prev
        new_hidden.append(h_new)
        x = h_new
    logits = jnp.dot(x, params["w_out"].T, precision=HI) + params["b_out"]
    return jax.nn.log_softmax(logits, axis=1), jnp.stack(new_hidden, 0)


def init_params(key, *, output_dim, hidden_dim, embbed_dim, num_layers):
    params = {}
    keys = jax.random.split(key, 3 + 6 * num_layers)
    ki = iter(keys)
    params["embedding"] = jax.random.normal(next(ki), (output_dim, embbed_dim),
                                            jnp.float32) * 0.1
    for l in range(num_layers):
        in_dim = embbed_dim if l == 0 else hidden_dim
        params[f"w_ih_l{l}"] = jax.random.normal(next(ki), (3 * hidden_dim, in_dim),
                                                 jnp.float32) * 0.1
        params[f"w_hh_l{l}"] = jax.random.normal(next(ki), (3 * hidden_dim, hidden_dim),
                                                 jnp.float32) * 0.1
        params[f"b_ih_l{l}"] = jax.random.normal(next(ki), (3 * hidden_dim,),
                                                 jnp.float32) * 0.1
        params[f"b_hh_l{l}"] = jax.random.normal(next(ki), (3 * hidden_dim,),
                                                 jnp.float32) * 0.1
        next(ki); next(ki)  # keep split count stable if layer count changes
    params["w_out"] = jax.random.normal(next(ki), (output_dim, hidden_dim),
                                        jnp.float32) * 0.1
    params["b_out"] = jax.random.normal(next(ki), (output_dim,), jnp.float32) * 0.1
    return params


if __name__ == "__main__":
    OUTPUT_DIM = 16      # vocab size
    HIDDEN_DIM = 32
    EMBED_DIM = 32
    NUM_LAYERS = 2
    BATCH = 8

    key = jax.random.PRNGKey(0)
    k_param, k_tok, k_hid = jax.random.split(key, 3)

    params = init_params(k_param, output_dim=OUTPUT_DIM, hidden_dim=HIDDEN_DIM,
                         embbed_dim=EMBED_DIM, num_layers=NUM_LAYERS)
    tokens = jax.random.randint(k_tok, (BATCH,), 0, OUTPUT_DIM, dtype=jnp.int32)
    hidden = jax.random.normal(k_hid, (NUM_LAYERS, BATCH, HIDDEN_DIM), jnp.float32)

    # one-time packing + hidden padding (outside the hot loop)
    packed = prepare_packed_params(params, output_dim=OUTPUT_DIM,
                                   hidden_dim=HIDDEN_DIM, embbed_dim=EMBED_DIM,
                                   num_layers=NUM_LAYERS)
    hidden_p = pad_hidden(hidden, packed)

    # jit the whole decode step (pallas_call + output slice) once
    decode_step = jax.jit(lambda tok, hid_p: decoder_forward(tok, hid_p, packed))

    pred, hidden_p_new = decode_step(tokens, hidden_p)
    jax.block_until_ready((pred, hidden_p_new))

    new_hidden = unpad_hidden(hidden_p_new, packed)   # unpad once, outside the loop

    pred_ref, hidden_ref = decoder_reference(
        tokens, hidden, params, output_dim=OUTPUT_DIM, hidden_dim=HIDDEN_DIM,
        embbed_dim=EMBED_DIM, num_layers=NUM_LAYERS)

    assert pred.shape == (BATCH, OUTPUT_DIM)
    assert new_hidden.shape == (NUM_LAYERS, BATCH, HIDDEN_DIM)
    assert bool(jnp.all(jnp.isfinite(pred))) and bool(jnp.all(jnp.isfinite(new_hidden)))
    # bf16 weights + f32 accumulation vs f32-HIGHEST reference
    assert jnp.allclose(pred, pred_ref, atol=1e-2, rtol=1e-2)
    assert jnp.allclose(new_hidden, hidden_ref, atol=1e-2, rtol=1e-2)

    print("KERNEL_OK")
</pallas_src>

<mosaic_0001>
module attributes {stable_mosaic.version = 11 : i64} {
  func.func @kernel(%arg0: i32, %arg1: memref<8xi32, #tpu.memory_space<smem>>, %arg2: memref<16x128xf32, #tpu.memory_space<vmem>>, %arg3: memref<2x8x128xf32, #tpu.memory_space<vmem>>, %arg4: memref<128x512xbf16, #tpu.memory_space<vmem>>, %arg5: memref<128x512xbf16, #tpu.memory_space<vmem>>, %arg6: memref<1x512xf32, #tpu.memory_space<vmem>>, %arg7: memref<128x512xbf16, #tpu.memory_space<vmem>>, %arg8: memref<128x512xbf16, #tpu.memory_space<vmem>>, %arg9: memref<1x512xf32, #tpu.memory_space<vmem>>, %arg10: memref<128x128xbf16, #tpu.memory_space<vmem>>, %arg11: memref<1x128xf32, #tpu.memory_space<vmem>>, %arg12: memref<8x128xf32, #tpu.memory_space<vmem>>, %arg13: memref<2x8x128xf32, #tpu.memory_space<vmem>>, %arg14: memref<8x128xf32, #tpu.memory_space<vmem>>) attributes {dimension_semantics = [#tpu.dimension_semantics<arbitrary>], iteration_bounds = array<i64: 1>, scalar_prefetch = 1 : i64, scratch_operands = 1 : i64, tpu.core_type = #tpu.core_type<tc>, window_params = [{pipeline_mode = #tpu.pipeline_mode<synchronous>, transform_indices = @transform_0, window_bounds = array<i64: 16, 128>}, {pipeline_mode = #tpu.pipeline_mode<synchronous>, transform_indices = @transform_1, window_bounds = array<i64: 2, 8, 128>}, {pipeline_mode = #tpu.pipeline_mode<synchronous>, transform_indices = @transform_2, window_bounds = array<i64: 128, 512>}, {pipeline_mode = #tpu.pipeline_mode<synchronous>, transform_indices = @transform_3, window_bounds = array<i64: 128, 512>}, {pipeline_mode = #tpu.pipeline_mode<synchronous>, transform_indices = @transform_4, window_bounds = array<i64: 1, 512>}, {pipeline_mode = #tpu.pipeline_mode<synchronous>, transform_indices = @transform_5, window_bounds = array<i64: 128, 512>}, {pipeline_mode = #tpu.pipeline_mode<synchronous>, transform_indices = @transform_6, window_bounds = array<i64: 128, 512>}, {pipeline_mode = #tpu.pipeline_mode<synchronous>, transform_indices = @transform_7, window_bounds = array<i64: 1, 512>}, {pipeline_mode = #tpu.pipeline_mode<synchronous>, transform_indices = @transform_8, window_bounds = array<i64: 128, 128>}, {pipeline_mode = #tpu.pipeline_mode<synchronous>, transform_indices = @transform_9, window_bounds = array<i64: 1, 128>}, {pipeline_mode = #tpu.pipeline_mode<synchronous>, transform_indices = @transform_10, window_bounds = array<i64: 8, 128>}, {pipeline_mode = #tpu.pipeline_mode<synchronous>, transform_indices = @transform_11, window_bounds = array<i64: 2, 8, 128>}]} {
    %c0 = arith.constant 0 : index
    %0 = memref.load %arg1[%c0] : memref<8xi32, #tpu.memory_space<smem>>
    %1 = arith.index_cast %0 : i32 to index
    %c0_0 = arith.constant 0 : index
    %2 = vector.load %arg2[%1, %c0_0] : memref<16x128xf32, #tpu.memory_space<vmem>>, vector<1x128xf32>
    %c0_1 = arith.constant 0 : index
    %c0_2 = arith.constant 0 : index
    %3 = vector.load %arg14[%c0_1, %c0_2] : memref<8x128xf32, #tpu.memory_space<vmem>>, vector<1x128xf32>
    tpu.vector_store %arg14[%c0_1, %c0_2], %2 {strides = array<i32>} : memref<8x128xf32, #tpu.memory_space<vmem>>, vector<1x128xf32>,
    %c1 = arith.constant 1 : index
    %4 = memref.load %arg1[%c1] : memref<8xi32, #tpu.memory_space<smem>>
    %5 = arith.index_cast %4 : i32 to index
    %c0_3 = arith.constant 0 : index
    %6 = vector.load %arg2[%5, %c0_3] : memref<16x128xf32, #tpu.memory_space<vmem>>, vector<1x128xf32>
    %c1_4 = arith.constant 1 : index
    %c0_5 = arith.constant 0 : index
    %7 = vector.load %arg14[%c1_4, %c0_5] : memref<8x128xf32, #tpu.memory_space<vmem>>, vector<1x128xf32>
    tpu.vector_store %arg14[%c1_4, %c0_5], %6 {strides = array<i32>} : memref<8x128xf32, #tpu.memory_space<vmem>>, vector<1x128xf32>,
    %c2 = arith.constant 2 : index
    %8 = memref.load %arg1[%c2] : memref<8xi32, #tpu.memory_space<smem>>
    %9 = arith.index_cast %8 : i32 to index
    %c0_6 = arith.constant 0 : index
    %10 = vector.load %arg2[%9, %c0_6] : memref<16x128xf32, #tpu.memory_space<vmem>>, vector<1x128xf32>
    %c2_7 = arith.constant 2 : index
    %c0_8 = arith.constant 0 : index
    %11 = vector.load %arg14[%c2_7, %c0_8] : memref<8x128xf32, #tpu.memory_space<vmem>>, vector<1x128xf32>
    tpu.vector_store %arg14[%c2_7, %c0_8], %10 {strides = array<i32>} : memref<8x128xf32, #tpu.memory_space<vmem>>, vector<1x128xf32>,
    %c3 = arith.constant 3 : index
    %12 = memref.load %arg1[%c3] : memref<8xi32, #tpu.memory_space<smem>>
    %13 = arith.index_cast %12 : i32 to index
    %c0_9 = arith.constant 0 : index
    %14 = vector.load %arg2[%13, %c0_9] : memref<16x128xf32, #tpu.memory_space<vmem>>, vector<1x128xf32>
    %c3_10 = arith.constant 3 : index
    %c0_11 = arith.constant 0 : index
    %15 = vector.load %arg14[%c3_10, %c0_11] : memref<8x128xf32, #tpu.memory_space<vmem>>, vector<1x128xf32>
    tpu.vector_store %arg14[%c3_10, %c0_11], %14 {strides = array<i32>} : memref<8x128xf32, #tpu.memory_space<vmem>>, vector<1x128xf32>,
    %c4 = arith.constant 4 : index
    %16 = memref.load %arg1[%c4] : memref<8xi32, #tpu.memory_space<smem>>
    %17 = arith.index_cast %16 : i32 to index
    %c0_12 = arith.constant 0 : index
    %18 = vector.load %arg2[%17, %c0_12] : memref<16x128xf32, #tpu.memory_space<vmem>>, vector<1x128xf32>
    %c4_13 = arith.constant 4 : index
    %c0_14 = arith.constant 0 : index
    %19 = vector.load %arg14[%c4_13, %c0_14] : memref<8x128xf32, #tpu.memory_space<vmem>>, vector<1x128xf32>
    tpu.vector_store %arg14[%c4_13, %c0_14], %18 {strides = array<i32>} : memref<8x128xf32, #tpu.memory_space<vmem>>, vector<1x128xf32>,
    %c5 = arith.constant 5 : index
    %20 = memref.load %arg1[%c5] : memref<8xi32, #tpu.memory_space<smem>>
    %21 = arith.index_cast %20 : i32 to index
    %c0_15 = arith.constant 0 : index
    %22 = vector.load %arg2[%21, %c0_15] : memref<16x128xf32, #tpu.memory_space<vmem>>, vector<1x128xf32>
    %c5_16 = arith.constant 5 : index
    %c0_17 = arith.constant 0 : index
    %23 = vector.load %arg14[%c5_16, %c0_17] : memref<8x128xf32, #tpu.memory_space<vmem>>, vector<1x128xf32>
    tpu.vector_store %arg14[%c5_16, %c0_17], %22 {strides = array<i32>} : memref<8x128xf32, #tpu.memory_space<vmem>>, vector<1x128xf32>,
    %c6 = arith.constant 6 : index
    %24 = memref.load %arg1[%c6] : memref<8xi32, #tpu.memory_space<smem>>
    %25 = arith.index_cast %24 : i32 to index
    %c0_18 = arith.constant 0 : index
    %26 = vector.load %arg2[%25, %c0_18] : memref<16x128xf32, #tpu.memory_space<vmem>>, vector<1x128xf32>
    %c6_19 = arith.constant 6 : index
    %c0_20 = arith.constant 0 : index
    %27 = vector.load %arg14[%c6_19, %c0_20] : memref<8x128xf32, #tpu.memory_space<vmem>>, vector<1x128xf32>
    tpu.vector_store %arg14[%c6_19, %c0_20], %26 {strides = array<i32>} : memref<8x128xf32, #tpu.memory_space<vmem>>, vector<1x128xf32>,
    %c7 = arith.constant 7 : index
    %28 = memref.load %arg1[%c7] : memref<8xi32, #tpu.memory_space<smem>>
    %29 = arith.index_cast %28 : i32 to index
    %c0_21 = arith.constant 0 : index
    %30 = vector.load %arg2[%29, %c0_21] : memref<16x128xf32, #tpu.memory_space<vmem>>, vector<1x128xf32>
    %c7_22 = arith.constant 7 : index
    %c0_23 = arith.constant 0 : index
    %31 = vector.load %arg14[%c7_22, %c0_23] : memref<8x128xf32, #tpu.memory_space<vmem>>, vector<1x128xf32>
    tpu.vector_store %arg14[%c7_22, %c0_23], %30 {strides = array<i32>} : memref<8x128xf32, #tpu.memory_space<vmem>>, vector<1x128xf32>,
    %c0_24 = arith.constant 0 : index
    %c0_25 = arith.constant 0 : index
    %32 = vector.load %arg14[%c0_24, %c0_25] : memref<8x128xf32, #tpu.memory_space<vmem>>, vector<8x128xf32>
    %cst = arith.constant 0.000000e+00 : f32
    %33 = vector.broadcast %cst : f32 to vector<8x128xf32>
    %34 = arith.maximumf %32, %33 : vector<8x128xf32>
    %35 = arith.truncf %34 : vector<8x128xf32> to vector<8x128xbf16>
    %c0_26 = arith.constant 0 : index
    %c0_27 = arith.constant 0 : index
    %c0_28 = arith.constant 0 : index
    %36 = vector.load %arg3[%c0_26, %c0_27, %c0_28] : memref<2x8x128xf32, #tpu.memory_space<vmem>>, vector<1x8x128xf32>
    %37 = vector.shape_cast %36 : vector<1x8x128xf32> to vector<8x128xf32>
    %c0_29 = arith.constant 0 : index
    %c0_30 = arith.constant 0 : index
    %38 = vector.load %arg4[%c0_29, %c0_30] : memref<128x512xbf16, #tpu.memory_space<vmem>>, vector<128x512xbf16>
    %cst_31 = arith.constant dense<0.000000e+00> : vector<8x512xf32>
    %39 = tpu.matmul %35, %38, %cst_31 {dimension_numbers = #tpu.dot_dimension_numbers<[1], [0], [0], [1], [0, 0, 1, 1], [], []>} : vector<8x128xbf16>, vector<128x512xbf16>, vector<8x512xf32> -> vector<8x512xf32>
    %40 = arith.truncf %37 : vector<8x128xf32> to vector<8x128xbf16>
    %c0_32 = arith.constant 0 : index
    %c0_33 = arith.constant 0 : index
    %41 = vector.load %arg5[%c0_32, %c0_33] : memref<128x512xbf16, #tpu.memory_space<vmem>>, vector<128x512xbf16>
    %cst_34 = arith.constant dense<0.000000e+00> : vector<8x512xf32>
    %42 = tpu.matmul %40, %41, %cst_34 {dimension_numbers = #tpu.dot_dimension_numbers<[1], [0], [0], [1], [0, 0, 1, 1], [], []>} : vector<8x128xbf16>, vector<128x512xbf16>, vector<8x512xf32> -> vector<8x512xf32>
    %43 = arith.addf %39, %42 : vector<8x512xf32>
    %c0_35 = arith.constant 0 : index
    %c0_36 = arith.constant 0 : index
    %44 = vector.load %arg6[%c0_35, %c0_36] : memref<1x512xf32, #tpu.memory_space<vmem>>, vector<1x512xf32>
    %45 = vector.broadcast %44 : vector<1x512xf32> to vector<8x512xf32>
    %46 = arith.addf %43, %45 : vector<8x512xf32>
    %47 = vector.extract_strided_slice %46 {offsets = [0, 0], sizes = [8, 128], strides = [1, 1]} : vector<8x512xf32> to vector<8x128xf32>
    %48 = arith.negf %47 : vector<8x128xf32>
    %49 = math.exp %48 : vector<8x128xf32>
    %cst_37 = arith.constant 1.000000e+00 : f32
    %50 = vector.broadcast %cst_37 : f32 to vector<8x128xf32>
    %51 = arith.addf %50, %49 : vector<8x128xf32>
    %52 = arith.divf %50, %51 : vector<8x128xf32>
    %53 = vector.extract_strided_slice %46 {offsets = [0, 128], sizes = [8, 128], strides = [1, 1]} : vector<8x512xf32> to vector<8x128xf32>
    %54 = arith.negf %53 : vector<8x128xf32>
    %55 = math.exp %54 : vector<8x128xf32>
    %cst_38 = arith.constant 1.000000e+00 : f32
    %56 = vector.broadcast %cst_38 : f32 to vector<8x128xf32>
    %57 = arith.addf %56, %55 : vector<8x128xf32>
    %58 = arith.divf %56, %57 : vector<8x128xf32>
    %59 = vector.extract_strided_slice %46 {offsets = [0, 256], sizes = [8, 128], strides = [1, 1]} : vector<8x512xf32> to vector<8x128xf32>
    %60 = vector.extract_strided_slice %46 {offsets = [0, 384], sizes = [8, 128], strides = [1, 1]} : vector<8x512xf32> to vector<8x128xf32>
    %61 = arith.mulf %52, %60 : vector<8x128xf32>
    %62 = arith.addf %59, %61 : vector<8x128xf32>
    %63 = math.tanh %62 : vector<8x128xf32>
    %cst_39 = arith.constant 1.000000e+00 : f32
    %64 = vector.broadcast %cst_39 : f32 to vector<8x128xf32>
    %65 = arith.subf %64, %58 : vector<8x128xf32>
    %66 = arith.mulf %65, %63 : vector<8x128xf32>
    %67 = arith.mulf %58, %37 : vector<8x128xf32>
    %68 = arith.addf %66, %67 : vector<8x128xf32>
    %c0_40 = arith.constant 0 : index
    %c0_41 = arith.constant 0 : index
    %c0_42 = arith.constant 0 : index
    %69 = vector.load %arg13[%c0_40, %c0_41, %c0_42] : memref<2x8x128xf32, #tpu.memory_space<vmem>>, vector<1x8x128xf32>
    %70 = vector.shape_cast %69 : vector<1x8x128xf32> to vector<8x128xf32>
    %71 = vector.shape_cast %68 : vector<8x128xf32> to vector<1x8x128xf32>
    tpu.vector_store %arg13[%c0_40, %c0_41, %c0_42], %71 {strides = array<i32>} : memref<2x8x128xf32, #tpu.memory_space<vmem>>, vector<1x8x128xf32>,
    %72 = arith.truncf %68 : vector<8x128xf32> to vector<8x128xbf16>
    %c1_43 = arith.constant 1 : index
    %c0_44 = arith.constant 0 : index
    %c0_45 = arith.constant 0 : index
    %73 = vector.load %arg3[%c1_43, %c0_44, %c0_45] : memref<2x8x128xf32, #tpu.memory_space<vmem>>, vector<1x8x128xf32>
    %74 = vector.shape_cast %73 : vector<1x8x128xf32> to vector<8x128xf32>
    %c0_46 = arith.constant 0 : index
    %c0_47 = arith.constant 0 : index
    %75 = vector.load %arg7[%c0_46, %c0_47] : memref<128x512xbf16, #tpu.memory_space<vmem>>, vector<128x512xbf16>
    %cst_48 = arith.constant dense<0.000000e+00> : vector<8x512xf32>
    %76 = tpu.matmul %72, %75, %cst_48 {dimension_numbers = #tpu.dot_dimension_numbers<[1], [0], [0], [1], [0, 0, 1, 1], [], []>} : vector<8x128xbf16>, vector<128x512xbf16>, vector<8x512xf32> -> vector<8x512xf32>
    %77 = arith.truncf %74 : vector<8x128xf32> to vector<8x128xbf16>
    %c0_49 = arith.constant 0 : index
    %c0_50 = arith.constant 0 : index
    %78 = vector.load %arg8[%c0_49, %c0_50] : memref<128x512xbf16, #tpu.memory_space<vmem>>, vector<128x512xbf16>
    %cst_51 = arith.constant dense<0.000000e+00> : vector<8x512xf32>
    %79 = tpu.matmul %77, %78, %cst_51 {dimension_numbers = #tpu.dot_dimension_numbers<[1], [0], [0], [1], [0, 0, 1, 1], [], []>} : vector<8x128xbf16>, vector<128x512xbf16>, vector<8x512xf32> -> vector<8x512xf32>
    %80 = arith.addf %76, %79 : vector<8x512xf32>
    %c0_52 = arith.constant 0 : index
    %c0_53 = arith.constant 0 : index
    %81 = vector.load %arg9[%c0_52, %c0_53] : memref<1x512xf32, #tpu.memory_space<vmem>>, vector<1x512xf32>
    %82 = vector.broadcast %81 : vector<1x512xf32> to vector<8x512xf32>
    %83 = arith.addf %80, %82 : vector<8x512xf32>
    %84 = vector.extract_strided_slice %83 {offsets = [0, 0], sizes = [8, 128], strides = [1, 1]} : vector<8x512xf32> to vector<8x128xf32>
    %85 = arith.negf %84 : vector<8x128xf32>
    %86 = math.exp %85 : vector<8x128xf32>
    %cst_54 = arith.constant 1.000000e+00 : f32
    %87 = vector.broadcast %cst_54 : f32 to vector<8x128xf32>
    %88 = arith.addf %87, %86 : vector<8x128xf32>
    %89 = arith.divf %87, %88 : vector<8x128xf32>
    %90 = vector.extract_strided_slice %83 {offsets = [0, 128], sizes = [8, 128], strides = [1, 1]} : vector<8x512xf32> to vector<8x128xf32>
    %91 = arith.negf %90 : vector<8x128xf32>
    %92 = math.exp %91 : vector<8x128xf32>
    %cst_55 = arith.constant 1.000000e+00 : f32
    %93 = vector.broadcast %cst_55 : f32 to vector<8x128xf32>
    %94 = arith.addf %93, %92 : vector<8x128xf32>
    %95 = arith.divf %93, %94 : vector<8x128xf32>
    %96 = vector.extract_strided_slice %83 {offsets = [0, 256], sizes = [8, 128], strides = [1, 1]} : vector<8x512xf32> to vector<8x128xf32>
    %97 = vector.extract_strided_slice %83 {offsets = [0, 384], sizes = [8, 128], strides = [1, 1]} : vector<8x512xf32> to vector<8x128xf32>
    %98 = arith.mulf %89, %97 : vector<8x128xf32>
    %99 = arith.addf %96, %98 : vector<8x128xf32>
    %100 = math.tanh %99 : vector<8x128xf32>
    %cst_56 = arith.constant 1.000000e+00 : f32
    %101 = vector.broadcast %cst_56 : f32 to vector<8x128xf32>
    %102 = arith.subf %101, %95 : vector<8x128xf32>
    %103 = arith.mulf %102, %100 : vector<8x128xf32>
    %104 = arith.mulf %95, %74 : vector<8x128xf32>
    %105 = arith.addf %103, %104 : vector<8x128xf32>
    %c1_57 = arith.constant 1 : index
    %c0_58 = arith.constant 0 : index
    %c0_59 = arith.constant 0 : index
    %106 = vector.load %arg13[%c1_57, %c0_58, %c0_59] : memref<2x8x128xf32, #tpu.memory_space<vmem>>, vector<1x8x128xf32>
    %107 = vector.shape_cast %106 : vector<1x8x128xf32> to vector<8x128xf32>
    %108 = vector.shape_cast %105 : vector<8x128xf32> to vector<1x8x128xf32>
    tpu.vector_store %arg13[%c1_57, %c0_58, %c0_59], %108 {strides = array<i32>} : memref<2x8x128xf32, #tpu.memory_space<vmem>>, vector<1x8x128xf32>,
    %109 = arith.truncf %105 : vector<8x128xf32> to vector<8x128xbf16>
    %c0_60 = arith.constant 0 : index
    %c0_61 = arith.constant 0 : index
    %110 = vector.load %arg10[%c0_60, %c0_61] : memref<128x128xbf16, #tpu.memory_space<vmem>>, vector<128x128xbf16>
    %cst_62 = arith.constant dense<0.000000e+00> : vector<8x128xf32>
    %111 = tpu.matmul %109, %110, %cst_62 {dimension_numbers = #tpu.dot_dimension_numbers<[1], [0], [0], [1], [0, 0, 1, 1], [], []>} : vector<8x128xbf16>, vector<128x128xbf16>, vector<8x128xf32> -> vector<8x128xf32>
    %c0_63 = arith.constant 0 : index
    %c0_64 = arith.constant 0 : index
    %112 = vector.load %arg11[%c0_63, %c0_64] : memref<1x128xf32, #tpu.memory_space<vmem>>, vector<1x128xf32>
    %113 = vector.broadcast %112 : vector<1x128xf32> to vector<8x128xf32>
    %114 = arith.addf %111, %113 : vector<8x128xf32>
    %cst_65 = arith.constant dense<0xFF800000> : vector<8xf32>
    %115 = vector.multi_reduction <maximumf>, %114, %cst_65 [1] : vector<8x128xf32> to vector<8xf32>
    %116 = vector.shape_cast %115 : vector<8xf32> to vector<8x1xf32>
    %117 = vector.broadcast %116 : vector<8x1xf32> to vector<8x128xf32>
    %118 = arith.subf %114, %117 : vector<8x128xf32>
    %119 = math.exp %118 : vector<8x128xf32>
    %cst_66 = arith.constant dense<0.000000e+00> : vector<8xf32>
    %120 = vector.multi_reduction <add>, %119, %cst_66 [1] : vector<8x128xf32> to vector<8xf32>
    %121 = vector.shape_cast %120 : vector<8xf32> to vector<8x1xf32>
    %122 = math.log %121 : vector<8x1xf32>
    %123 = vector.broadcast %122 : vector<8x1xf32> to vector<8x128xf32>
    %124 = arith.subf %118, %123 : vector<8x128xf32>
    %c0_67 = arith.constant 0 : index
    %c0_68 = arith.constant 0 : index
    %125 = vector.load %arg12[%c0_67, %c0_68] : memref<8x128xf32, #tpu.memory_space<vmem>>, vector<8x128xf32>
    tpu.vector_store %arg12[%c0_67, %c0_68], %124 {strides = array<i32>} : memref<8x128xf32, #tpu.memory_space<vmem>>, vector<8x128xf32>,
    return
  }
  func.func @transform_0(%arg0: i32, %arg1: memref<8xi32, #tpu.memory_space<smem>>) -> (i32, i32) {
    %c0_i32 = arith.constant 0 : i32
    %c0_i32_0 = arith.constant 0 : i32
    %c0_i32_1 = arith.constant 0 : i32
    return %c0_i32, %c0_i32_0 : i32, i32
  }
  func.func @transform_1(%arg0: i32, %arg1: memref<8xi32, #tpu.memory_space<smem>>) -> (i32, i32, i32) {
    %c0_i32 = arith.constant 0 : i32
    %c0_i32_0 = arith.constant 0 : i32
    %c0_i32_1 = arith.constant 0 : i32
    %c0_i32_2 = arith.constant 0 : i32
    return %c0_i32, %c0_i32_0, %c0_i32_1 : i32, i32, i32
  }
  func.func @transform_2(%arg0: i32, %arg1: memref<8xi32, #tpu.memory_space<smem>>) -> (i32, i32) {
    %c0_i32 = arith.constant 0 : i32
    %c0_i32_0 = arith.constant 0 : i32
    %c0_i32_1 = arith.constant 0 : i32
    return %c0_i32, %c0_i32_0 : i32, i32
  }
  func.func @transform_3(%arg0: i32, %arg1: memref<8xi32, #tpu.memory_space<smem>>) -> (i32, i32) {
    %c0_i32 = arith.constant 0 : i32
    %c0_i32_0 = arith.constant 0 : i32
    %c0_i32_1 = arith.constant 0 : i32
    return %c0_i32, %c0_i32_0 : i32, i32
  }
  func.func @transform_4(%arg0: i32, %arg1: memref<8xi32, #tpu.memory_space<smem>>) -> (i32, i32) {
    %c0_i32 = arith.constant 0 : i32
    %c0_i32_0 = arith.constant 0 : i32
    %c0_i32_1 = arith.constant 0 : i32
    return %c0_i32, %c0_i32_0 : i32, i32
  }
  func.func @transform_5(%arg0: i32, %arg1: memref<8xi32, #tpu.memory_space<smem>>) -> (i32, i32) {
    %c0_i32 = arith.constant 0 : i32
    %c0_i32_0 = arith.constant 0 : i32
    %c0_i32_1 = arith.constant 0 : i32
    return %c0_i32, %c0_i32_0 : i32, i32
  }
  func.func @transform_6(%arg0: i32, %arg1: memref<8xi32, #tpu.memory_space<smem>>) -> (i32, i32) {
    %c0_i32 = arith.constant 0 : i32
    %c0_i32_0 = arith.constant 0 : i32
    %c0_i32_1 = arith.constant 0 : i32
    return %c0_i32, %c0_i32_0 : i32, i32
  }
  func.func @transform_7(%arg0: i32, %arg1: memref<8xi32, #tpu.memory_space<smem>>) -> (i32, i32) {
    %c0_i32 = arith.constant 0 : i32
    %c0_i32_0 = arith.constant 0 : i32
    %c0_i32_1 = arith.constant 0 : i32
    return %c0_i32, %c0_i32_0 : i32, i32
  }
  func.func @transform_8(%arg0: i32, %arg1: memref<8xi32, #tpu.memory_space<smem>>) -> (i32, i32) {
    %c0_i32 = arith.constant 0 : i32
    %c0_i32_0 = arith.constant 0 : i32
    %c0_i32_1 = arith.constant 0 : i32
    return %c0_i32, %c0_i32_0 : i32, i32
  }
  func.func @transform_9(%arg0: i32, %arg1: memref<8xi32, #tpu.memory_space<smem>>) -> (i32, i32) {
    %c0_i32 = arith.constant 0 : i32
    %c0_i32_0 = arith.constant 0 : i32
    %c0_i32_1 = arith.constant 0 : i32
    return %c0_i32, %c0_i32_0 : i32, i32
  }
  func.func @transform_10(%arg0: i32, %arg1: memref<8xi32, #tpu.memory_space<smem>>) -> (i32, i32) {
    %c0_i32 = arith.constant 0 : i32
    %c0_i32_0 = arith.constant 0 : i32
    %c0_i32_1 = arith.constant 0 : i32
    return %c0_i32, %c0_i32_0 : i32, i32
  }
  func.func @transform_11(%arg0: i32, %arg1: memref<8xi32, #tpu.memory_space<smem>>) -> (i32, i32, i32) {
    %c0_i32 = arith.constant 0 : i32
    %c0_i32_0 = arith.constant 0 : i32
    %c0_i32_1 = arith.constant 0 : i32
    %c0_i32_2 = arith.constant 0 : i32
    return %c0_i32, %c0_i32_0, %c0_i32_1 : i32, i32, i32
  }
}

</mosaic_0001>

<bundles_post_ra>
// kernel: _lambda_.1
= control target key start
LH: loop header
LB: loop body
LE: loop exit
PB: predicated region body
PF: predicated region fallthrough
CT: control target
= control target key end

     0   :  { %s2473_s0 = inlined_call_operand.vmem [shape: s32[8], index: 0, kind: input, shape index: {}]   ;;  %s2474_s1 = inlined_call_operand.vmem [shape: f32[16,128], index: 1, kind: input, shape index: {}]   ;;  %s2475_s2 = inlined_call_operand.vmem [shape: f32[2,8,128], index: 2, kind: input, shape index: {}, may-alias: {2,12}]   ;;  %s2476_s3 = inlined_call_operand.vmem [shape: bf16[128,512], index: 3, kind: input, shape index: {}]   ;;  %s2477_s4 = inlined_call_operand.vmem [shape: bf16[128,512], index: 4, kind: input, shape index: {}]   ;;  %s2478_s5 = inlined_call_operand.vmem [shape: f32[1,512], index: 5, kind: input, shape index: {}]   ;;  %s2479_s6 = inlined_call_operand.vmem [shape: bf16[128,512], index: 6, kind: input, shape index: {}]   ;;  %s2480_s7 = inlined_call_operand.vmem [shape: bf16[128,512], index: 7, kind: input, shape index: {}]   ;;  %s2481_s8 = inlined_call_operand.vmem [shape: f32[1,512], index: 8, kind: input, shape index: {}]   ;;  %s2482_s9 = inlined_call_operand.vmem [shape: bf16[128,128], index: 9, kind: input, shape index: {}]   ;;  %s2483_s10 = inlined_call_operand.vmem [shape: f32[1,128], index: 10, kind: input, shape index: {}]   ;;  %s2484_s11 = inlined_call_operand.hbm [shape: f32[8,128], index: 11, kind: output, shape index: {0}]   ;;  %s2485_s12 = inlined_call_operand.vmem [shape: f32[2,8,128], index: 12, kind: output, shape index: {1}, may-alias: {2,12}]  }
   0x1   :  { %2487 = sst [smem:[#allocation9_spill]] %s2481_s8  ;;  %s18_s23 = sshll.u32 %s2473_s0, 4  ;;  %s19_s23 = int_to_ptr.vmem [resolvable:$true] %s18_s23 }
   0x2   :  { %2488 = sst [smem:[#allocation10_spill]] %s2483_s10  ;;  %s1833_s24 = scalar_lea.vmem %s19_s23, 16 }
   0x3   :  { %2489 = sst [smem:[#allocation11_spill]] %s2484_s11  ;;  %p1834_p0 = scmp.ne.s32.totalorder %s19_s23, %s1833_s24 }
   0x4   :  { %p1838_p1 = scmp.lt.s32.totalorder %s19_s23, %s19_s23  ;;  %p1839_p2 = scmp.lt.s32.totalorder %s1833_s24, %s1833_s24 }
   0x6   :  { %p1840_p3 = por %p1839_p2, %p1838_p1 }
   0x8   :  { %p1841_p4 = pnand %p1840_p3, %p1834_p0 }
   0xa   :  { %1844 = shalt.err (!%p1841_p4)  }
   0xb   :  { %s1871_s25 = smov [#allocation4]  }
   0xc   :  { %21 = dma.vmem_to_smem %s19_s23, 16, %s1871_s25, [#allocation3] }
   0xd   :  { %1867 = dma.done.wait [#allocation3], 16 }
   0xe   :  { %1868 = vsyncadd [#allocation3], 4294967280 }
   0xf   :  { %23 = sfence }
  0x10   :  { %v1609_v0 = vld [vmem:[%s2477_s4 + $0x4] ss:$16 sps:$4 sm:$0xff]   ;;  %v1611_v1 = vld [vmem:[%s2477_s4 + $0xc] ss:$16 sps:$4 sm:$0xff]   ;;  %v1872_v2 = vmov 0   ;;  %s2042_s14 = sld [smem:[#allocation4]] }
  0x11   :  { %339 = vmatprep.mubr.bf16.mxu0 %v1872_v2  ;;  %380 = vmatprep.mubr.bf16.mxu1 %v1872_v2  ;;  %v1613_v3 = vld [vmem:[%s2477_s4] ss:$16 sps:$4 sm:$0xff]   ;;  %v1614_v4 = vld [vmem:[%s2477_s4 + $0x8] ss:$16 sps:$4 sm:$0xff]   ;;  %v1615_v5 = vld [vmem:[%s2477_s4 + $0x24] ss:$16 sps:$4 sm:$0xff]  }
  0x12   :  { %307 = vmatprep.subr.bf16.mxu0 %v1609_v0  ;;  %348 = vmatprep.subr.bf16.mxu1 %v1611_v1  ;;  %v1617_v6 = vld [vmem:[%s2477_s4 + $0x2c] ss:$16 sps:$4 sm:$0xff]   ;;  %v1619_v7 = vld [vmem:[%s2477_s4 + $0x20] ss:$16 sps:$4 sm:$0xff]   ;;  %v1620_v8 = vld [vmem:[%s2477_s4 + $0x28] ss:$16 sps:$4 sm:$0xff]  }
  0x13   :  { %308 = vmatpush1.bf16.msra.mxu0 %v1613_v3  ;;  %349 = vmatpush1.bf16.msra.mxu1 %v1614_v4  ;;  %v1621_v9 = vld [vmem:[%s2477_s4 + $0x44] ss:$16 sps:$4 sm:$0xff]   ;;  %v1623_v10 = vld [vmem:[%s2477_s4 + $0x4c] ss:$16 sps:$4 sm:$0xff]   ;;  %v1625_v11 = vld [vmem:[%s2477_s4 + $0x40] ss:$16 sps:$4 sm:$0xff]  }
  0x14   :  { %309 = vmatprep.subr.bf16.mxu0 %v1615_v5  ;;  %350 = vmatprep.subr.bf16.mxu1 %v1617_v6  ;;  %v1626_v12 = vld [vmem:[%s2477_s4 + $0x48] ss:$16 sps:$4 sm:$0xff]   ;;  %v1627_v13 = vld [vmem:[%s2477_s4 + $0x64] ss:$16 sps:$4 sm:$0xff]   ;;  %v1629_v14 = vld [vmem:[%s2477_s4 + $0x6c] ss:$16 sps:$4 sm:$0xff]  }
  0x15   :  { %v1631_v15 = vld [vmem:[%s2477_s4 + $0x60] ss:$16 sps:$4 sm:$0xff]   ;;  %v1632_v16 = vld [vmem:[%s2477_s4 + $0x68] ss:$16 sps:$4 sm:$0xff]   ;;  %v1633_v17 = vld [vmem:[%s2477_s4 + $0x84] ss:$16 sps:$4 sm:$0xff]  }
  0x16   :  { %v1635_v18 = vld [vmem:[%s2477_s4 + $0x8c] ss:$16 sps:$4 sm:$0xff]   ;;  %v1637_v19 = vld [vmem:[%s2477_s4 + $0x80] ss:$16 sps:$4 sm:$0xff]   ;;  %v1638_v20 = vld [vmem:[%s2477_s4 + $0x88] ss:$16 sps:$4 sm:$0xff]   ;;  %s47_s18 = scalar_lea.vmem %s2474_s1, %s2042_s14 }
  0x17   :  { %310 = vmatpush1.bf16.msra.mxu0 %v1619_v7  ;;  %351 = vmatpush1.bf16.msra.mxu1 %v1620_v8  ;;  %v1639_v21 = vld [vmem:[%s2477_s4 + $0xa4] ss:$16 sps:$4 sm:$0xff]   ;;  %v1641_v22 = vld [vmem:[%s2477_s4 + $0xac] ss:$16 sps:$4 sm:$0xff]   ;;  %v1643_v23 = vld [vmem:[%s2477_s4 + $0xa0] ss:$16 sps:$4 sm:$0xff]  }
  0x18   :  { %311 = vmatprep.subr.bf16.mxu0 %v1621_v9  ;;  %352 = vmatprep.subr.bf16.mxu1 %v1623_v10  ;;  %v1644_v24 = vld [vmem:[%s2477_s4 + $0xa8] ss:$16 sps:$4 sm:$0xff]   ;;  %v1645_v25 = vld [vmem:[%s2477_s4 + $0xc4] ss:$16 sps:$4 sm:$0xff]   ;;  %v1647_v26 = vld [vmem:[%s2477_s4 + $0xcc] ss:$16 sps:$4 sm:$0xff]  }
  0x19   :  { %v1649_v27 = vld [vmem:[%s2477_s4 + $0xc0] ss:$16 sps:$4 sm:$0xff]   ;;  %v1650_v28 = vld [vmem:[%s2477_s4 + $0xc8] ss:$16 sps:$4 sm:$0xff]   ;;  %v1651_v29 = vld [vmem:[%s2477_s4 + $0xe4] ss:$16 sps:$4 sm:$0xff]  }
  0x1a   :  { %v1653_v30 = vld [vmem:[%s2477_s4 + $0xec] ss:$16 sps:$4 sm:$0xff]   ;;  %v1655_v31 = vld [vmem:[%s2477_s4 + $0xe0] ss:$16 sps:$4 sm:$0xff]   ;;  %v1656_v32 = vld [vmem:[%s2477_s4 + $0xe8] ss:$16 sps:$4 sm:$0xff]  }
  0x1b   :  { %312 = vmatpush1.bf16.msra.mxu0 %v1625_v11  ;;  %353 = vmatpush1.bf16.msra.mxu1 %v1626_v12  ;;  %v2047_v33 = vld [vmem:[%s2475_s2] sm:$0xff]  ;;  %s2049_s17 = sld [smem:[#allocation4 + $0x1]]  ;;  %v1662_v35 = vld [vmem:[%s2476_s3 + $0xc] ss:$16 sps:$4 sm:$0xff]   ;;  %s2057_s4 = sld [smem:[#allocation4 + $0x2]] }
  0x1c   :  { %313 = vmatprep.subr.bf16.mxu0 %v1627_v13  ;;  %354 = vmatprep.subr.bf16.mxu1 %v1629_v14  ;;  %v1659_v34 = vld [vmem:[%s2476_s3 + $0x4] ss:$16 sps:$4 sm:$0xff]   ;;  %s2059_s22 = sld [smem:[#allocation4 + $0x3]]  ;;  %v114_v36 = vpack.c.bf16 %v2047_v33, %v2047_v33  ;;  %v1657_v37 = vld [vmem:[%s2476_s3] ss:$16 sps:$4 sm:$0xff]   ;;  %s2066_s25 = sld [smem:[#allocation4 + $0x4]] }
  0x1d   :  { %v1660_v38 = vld [vmem:[%s2476_s3 + $0x8] ss:$16 sps:$4 sm:$0xff]   ;;  %s2071_s28 = sld [smem:[#allocation4 + $0x5]]  ;;  %v1665_v39 = vld [vmem:[%s2476_s3 + $0x24] ss:$16 sps:$4 sm:$0xff]   ;;  %s2079_s15 = sld [smem:[#allocation4 + $0x6]] }
  0x1e   :  { %v1668_v40 = vld [vmem:[%s2476_s3 + $0x2c] ss:$16 sps:$4 sm:$0xff]   ;;  %s2081_s16 = sld [smem:[#allocation4 + $0x7]]  ;;  %v1663_v41 = vld [vmem:[%s2476_s3 + $0x20] ss:$16 sps:$4 sm:$0xff]  }
  0x1f   :  { %314 = vmatpush1.bf16.msra.mxu0 %v1631_v15  ;;  %355 = vmatpush1.bf16.msra.mxu1 %v1632_v16  ;;  %v1666_v42 = vld [vmem:[%s2476_s3 + $0x28] ss:$16 sps:$4 sm:$0xff]   ;;  %v1671_v43 = vld [vmem:[%s2476_s3 + $0x44] ss:$16 sps:$4 sm:$0xff]   ;;  %v1674_v44 = vld [vmem:[%s2476_s3 + $0x4c] ss:$16 sps:$4 sm:$0xff]  }
  0x20   :  { %315 = vmatprep.subr.bf16.mxu0 %v1633_v17  ;;  %356 = vmatprep.subr.bf16.mxu1 %v1635_v18  ;;  %v1669_v45 = vld [vmem:[%s2476_s3 + $0x40] ss:$16 sps:$4 sm:$0xff]   ;;  %v1672_v46 = vld [vmem:[%s2476_s3 + $0x48] ss:$16 sps:$4 sm:$0xff]   ;;  %v1677_v47 = vld [vmem:[%s2476_s3 + $0x64] ss:$16 sps:$4 sm:$0xff]  }
  0x21   :  { %s51_s21 = scalar_lea.vmem %s2474_s1, %s2049_s17  ;;  %s55_s29 = scalar_lea.vmem %s2474_s1, %s2057_s4  ;;  %v1680_v48 = vld [vmem:[%s2476_s3 + $0x6c] ss:$16 sps:$4 sm:$0xff]   ;;  %v1675_v49 = vld [vmem:[%s2476_s3 + $0x60] ss:$16 sps:$4 sm:$0xff]   ;;  %v1678_v50 = vld [vmem:[%s2476_s3 + $0x68] ss:$16 sps:$4 sm:$0xff]  }
  0x22   :  { %s59_s30 = scalar_lea.vmem %s2474_s1, %s2059_s22  ;;  %s63_s24 = scalar_lea.vmem %s2474_s1, %s2066_s25  ;;  %v1683_v51 = vld [vmem:[%s2476_s3 + $0x84] ss:$16 sps:$4 sm:$0xff]   ;;  %v1686_v52 = vld [vmem:[%s2476_s3 + $0x8c] ss:$16 sps:$4 sm:$0xff]   ;;  %v48_v53 = vld [vmem:[%s47_s18] sm:$0x1] }
  0x23   :  { %316 = vmatpush1.bf16.msra.mxu0 %v1637_v19  ;;  %357 = vmatpush1.bf16.msra.mxu1 %v1638_v20  ;;  %s67_s27 = scalar_lea.vmem %s2474_s1, %s2071_s28  ;;  %s71_s17 = scalar_lea.vmem %s2474_s1, %s2079_s15  ;;  %v52_v54 = vld [vmem:[%s51_s21] sm:$0x1]  ;;  %49 = vst [vmem:[#allocation2] sm:$0x1] %v48_v53  ;;  %v1684_v62 = vld [vmem:[%s2476_s3 + $0x88] ss:$16 sps:$4 sm:$0xff]  }
  0x24   :  { %317 = vmatprep.subr.bf16.mxu0 %v1639_v21  ;;  %358 = vmatprep.subr.bf16.mxu1 %v1641_v22  ;;  %s75_s25 = scalar_lea.vmem %s2474_s1, %s2081_s16  ;;  %v56_v55 = vld [vmem:[%s55_s29] sm:$0x1]  ;;  %53 = vst [vmem:[#allocation2 + $0x1] sm:$0x1] %v52_v54  ;;  %v1689_v63 = vld [vmem:[%s2476_s3 + $0xa4] ss:$16 sps:$4 sm:$0xff]  }
  0x25   :  { %57 = vst [vmem:[#allocation2 + $0x2] sm:$0x1] %v56_v55  ;;  %v60_v56 = vld [vmem:[%s59_s30] sm:$0x1]  ;;  %v1692_v0 = vld [vmem:[%s2476_s3 + $0xac] ss:$16 sps:$4 sm:$0xff]  }
  0x26   :  { %v64_v57 = vld [vmem:[%s63_s24] sm:$0x1]  ;;  %61 = vst [vmem:[#allocation2 + $0x3] sm:$0x1] %v60_v56  ;;  %v1690_v3 = vld [vmem:[%s2476_s3 + $0xa8] ss:$16 sps:$4 sm:$0xff]  }
  0x27   :  { %318 = vmatpush1.bf16.msra.mxu0 %v1643_v23  ;;  %359 = vmatpush1.bf16.msra.mxu1 %v1644_v24  ;;  %v68_v58 = vld [vmem:[%s67_s27] sm:$0x1]  ;;  %65 = vst [vmem:[#allocation2 + $0x4] sm:$0x1] %v64_v57  ;;  %v1695_v4 = vld [vmem:[%s2476_s3 + $0xc4] ss:$16 sps:$4 sm:$0xff]  }
  0x28   :  { %319 = vmatprep.subr.bf16.mxu0 %v1645_v25  ;;  %360 = vmatprep.subr.bf16.mxu1 %v1647_v26  ;;  %69 = vst [vmem:[#allocation2 + $0x5] sm:$0x1] %v68_v58  ;;  %v72_v59 = vld [vmem:[%s71_s17] sm:$0x1]  ;;  %v1698_v5 = vld [vmem:[%s2476_s3 + $0xcc] ss:$16 sps:$4 sm:$0xff]  }
  0x29   :  { %v76_v60 = vld [vmem:[%s75_s25] sm:$0x1]  ;;  %73 = vst [vmem:[#allocation2 + $0x6] sm:$0x1] %v72_v59  ;;  %v1696_v7 = vld [vmem:[%s2476_s3 + $0xc8] ss:$16 sps:$4 sm:$0xff]  }
  0x2a   :  { %v1681_v61 = vld [vmem:[%s2476_s3 + $0x80] ss:$16 sps:$4 sm:$0xff]   ;;  %77 = vst [vmem:[#allocation2 + $0x7] sm:$0x1] %v76_v60  ;;  %v1701_v9 = vld [vmem:[%s2476_s3 + $0xe4] ss:$16 sps:$4 sm:$0xff]  }
  0x2b   :  { %320 = vmatpush1.bf16.msra.mxu0 %v1649_v27  ;;  %361 = vmatpush1.bf16.msra.mxu1 %v1650_v28  ;;  %v1687_v1 = vld [vmem:[%s2476_s3 + $0xa0] ss:$16 sps:$4 sm:$0xff]   ;;  %v1704_v10 = vld [vmem:[%s2476_s3 + $0xec] ss:$16 sps:$4 sm:$0xff]   ;;  %v1702_v12 = vld [vmem:[%s2476_s3 + $0xe8] ss:$16 sps:$4 sm:$0xff]  }
  0x2c   :  { %321 = vmatprep.subr.bf16.mxu0 %v1651_v29  ;;  %362 = vmatprep.subr.bf16.mxu1 %v1653_v30  ;;  %v1693_v6 = vld [vmem:[%s2476_s3 + $0xc0] ss:$16 sps:$4 sm:$0xff]  }
  0x2d   :  { %v1699_v11 = vld [vmem:[%s2476_s3 + $0xe0] ss:$16 sps:$4 sm:$0xff]  }
  0x2f   :  { %322 = vmatpush1.bf16.msra.mxu0 %v1655_v31  ;;  %363 = vmatpush1.bf16.msra.mxu1 %v1656_v32 }
  0x30   :  { %549 = vmatprep.subr.bf16.mxu0 %v1659_v34  ;;  %590 = vmatprep.subr.bf16.mxu1 %v1662_v35 }
  0x31   :  { %v78_v8 = vld [vmem:[#allocation2] sm:$0xff] }
  0x32   :  { %340 = vmatmul.mubr.bf16.vlgmr.msra.gmra.mrb[0].mxu0 %v114_v36  ;;  %381 = vmatmul.mubr.bf16.vlgmr.msra.gmra.mrb[0].mxu1 %v114_v36  ;;  %v79_v13 = vmax.f32 %v78_v8, 0.0 }
  0x33   :  { %550 = vmatpush1.bf16.msra.mxu0 %v1657_v37  ;;  %591 = vmatpush1.bf16.msra.mxu1 %v1660_v38 }
  0x34   :  { %551 = vmatprep.subr.bf16.mxu0 %v1665_v39  ;;  %592 = vmatprep.subr.bf16.mxu1 %v1668_v40  ;;  %v80_v14 = vpack.c.bf16 %v79_v13, %v79_v13 }
  0x35   :  { %581 = vmatprep.mubr.bf16.mxu0 %v1872_v2  ;;  %622 = vmatprep.mubr.bf16.mxu1 %v1872_v2 }
  0x37   :  { %552 = vmatpush1.bf16.msra.mxu0 %v1663_v41  ;;  %593 = vmatpush1.bf16.msra.mxu1 %v1666_v42 }
  0x38   :  { %553 = vmatprep.subr.bf16.mxu0 %v1671_v43  ;;  %594 = vmatprep.subr.bf16.mxu1 %v1674_v44 }
  0x3b   :  { %554 = vmatpush1.bf16.msra.mxu0 %v1669_v45  ;;  %595 = vmatpush1.bf16.msra.mxu1 %v1672_v46 }
  0x3c   :  { %555 = vmatprep.subr.bf16.mxu0 %v1677_v47  ;;  %596 = vmatprep.subr.bf16.mxu1 %v1680_v48 }
  0x3f   :  { %556 = vmatpush1.bf16.msra.mxu0 %v1675_v49  ;;  %597 = vmatpush1.bf16.msra.mxu1 %v1678_v50 }
  0x40   :  { %557 = vmatprep.subr.bf16.mxu0 %v1683_v51  ;;  %598 = vmatprep.subr.bf16.mxu1 %v1686_v52 }
  0x43   :  { %558 = vmatpush1.bf16.msra.mxu0 %v1681_v61  ;;  %599 = vmatpush1.bf16.msra.mxu1 %v1684_v62 }
  0x44   :  { %559 = vmatprep.subr.bf16.mxu0 %v1689_v63  ;;  %600 = vmatprep.subr.bf16.mxu1 %v1692_v0 }
  0x47   :  { %560 = vmatpush1.bf16.msra.mxu0 %v1687_v1  ;;  %601 = vmatpush1.bf16.msra.mxu1 %v1690_v3 }
  0x48   :  { %561 = vmatprep.subr.bf16.mxu0 %v1695_v4  ;;  %602 = vmatprep.subr.bf16.mxu1 %v1698_v5 }
  0x4b   :  { %562 = vmatpush1.bf16.msra.mxu0 %v1693_v6  ;;  %603 = vmatpush1.bf16.msra.mxu1 %v1696_v7 }
  0x4c   :  { %563 = vmatprep.subr.bf16.mxu0 %v1701_v9  ;;  %604 = vmatprep.subr.bf16.mxu1 %v1704_v10 }
  0x4f   :  { %564 = vmatpush1.bf16.msra.mxu0 %v1699_v11  ;;  %605 = vmatpush1.bf16.msra.mxu1 %v1702_v12 }
  0x52   :  { %582 = vmatmul.mubr.bf16.vlgmr.msra.gmra.mrb[4].mxu0 %v80_v14  ;;  %623 = vmatmul.mubr.bf16.vlgmr.msra.gmra.mrb[4].mxu1 %v80_v14 }
  0x53   :  { %937 = vmatprep.mubr.bf16.mxu0 %v1872_v2  ;;  %978 = vmatprep.mubr.bf16.mxu1 %v1872_v2 }
  0x54   :  { %24 = vsyncpa [#allocation6], 0  ;;  %v1705_v15 = vld [vmem:[%s2480_s7] ss:$16 sps:$4 sm:$0xff]   ;;  %v1707_v16 = vld [vmem:[%s2480_s7 + $0x4] ss:$16 sps:$4 sm:$0xff]  }
  0x55   :  { %v1708_v17 = vld [vmem:[%s2480_s7 + $0x8] ss:$16 sps:$4 sm:$0xff]   ;;  %v1710_v18 = vld [vmem:[%s2480_s7 + $0xc] ss:$16 sps:$4 sm:$0xff]   ;;  %v1713_v19 = vld [vmem:[%s2480_s7 + $0x24] ss:$16 sps:$4 sm:$0xff]   ;;  %905 = vmatprep.subr.bf16.mxu0 %v1707_v16 }
  0x56   :  { %v1716_v20 = vld [vmem:[%s2480_s7 + $0x2c] ss:$16 sps:$4 sm:$0xff]   ;;  %906 = vmatpush1.bf16.msra.mxu0 %v1705_v15  ;;  %946 = vmatprep.subr.bf16.mxu1 %v1710_v18  ;;  %v1711_v21 = vld [vmem:[%s2480_s7 + $0x20] ss:$16 sps:$4 sm:$0xff]   ;;  %v1714_v22 = vld [vmem:[%s2480_s7 + $0x28] ss:$16 sps:$4 sm:$0xff]  }
  0x57   :  { %947 = vmatpush1.bf16.msra.mxu1 %v1708_v17  ;;  %907 = vmatprep.subr.bf16.mxu0 %v1713_v19  ;;  %v1719_v23 = vld [vmem:[%s2480_s7 + $0x44] ss:$16 sps:$4 sm:$0xff]   ;;  %v1722_v24 = vld [vmem:[%s2480_s7 + $0x4c] ss:$16 sps:$4 sm:$0xff]   ;;  %v1717_v25 = vld [vmem:[%s2480_s7 + $0x40] ss:$16 sps:$4 sm:$0xff]  }
  0x58   :  { %948 = vmatprep.subr.bf16.mxu1 %v1716_v20  ;;  %v1720_v26 = vld [vmem:[%s2480_s7 + $0x48] ss:$16 sps:$4 sm:$0xff]   ;;  %v1725_v27 = vld [vmem:[%s2480_s7 + $0x64] ss:$16 sps:$4 sm:$0xff]   ;;  %v1723_v28 = vld [vmem:[%s2480_s7 + $0x60] ss:$16 sps:$4 sm:$0xff]  }
  0x59   :  { %v1728_v29 = vld [vmem:[%s2480_s7 + $0x6c] ss:$16 sps:$4 sm:$0xff]   ;;  %v1726_v30 = vld [vmem:[%s2480_s7 + $0x68] ss:$16 sps:$4 sm:$0xff]   ;;  %v1731_v31 = vld [vmem:[%s2480_s7 + $0x84] ss:$16 sps:$4 sm:$0xff]  }
  0x5a   :  { %908 = vmatpush1.bf16.msra.mxu0 %v1711_v21  ;;  %v1729_v32 = vld [vmem:[%s2480_s7 + $0x80] ss:$16 sps:$4 sm:$0xff]   ;;  %v1734_v34 = vld [vmem:[%s2480_s7 + $0x8c] ss:$16 sps:$4 sm:$0xff]   ;;  %v1732_v35 = vld [vmem:[%s2480_s7 + $0x88] ss:$16 sps:$4 sm:$0xff]  }
  0x5b   :  { %949 = vmatpush1.bf16.msra.mxu1 %v1714_v22  ;;  %909 = vmatprep.subr.bf16.mxu0 %v1719_v23  ;;  %v1737_v36 = vld [vmem:[%s2480_s7 + $0xa4] ss:$16 sps:$4 sm:$0xff]   ;;  %v1735_v37 = vld [vmem:[%s2480_s7 + $0xa0] ss:$16 sps:$4 sm:$0xff]   ;;  %v1740_v38 = vld [vmem:[%s2480_s7 + $0xac] ss:$16 sps:$4 sm:$0xff]  }
  0x5c   :  { %950 = vmatprep.subr.bf16.mxu1 %v1722_v24  ;;  %v1738_v39 = vld [vmem:[%s2480_s7 + $0xa8] ss:$16 sps:$4 sm:$0xff]   ;;  %v1743_v40 = vld [vmem:[%s2480_s7 + $0xc4] ss:$16 sps:$4 sm:$0xff]   ;;  %v1741_v41 = vld [vmem:[%s2480_s7 + $0xc0] ss:$16 sps:$4 sm:$0xff]  }
  0x5d   :  { %v1746_v42 = vld [vmem:[%s2480_s7 + $0xcc] ss:$16 sps:$4 sm:$0xff]   ;;  %v1744_v43 = vld [vmem:[%s2480_s7 + $0xc8] ss:$16 sps:$4 sm:$0xff]   ;;  %v1749_v44 = vld [vmem:[%s2480_s7 + $0xe4] ss:$16 sps:$4 sm:$0xff]  }
  0x5e   :  { %910 = vmatpush1.bf16.msra.mxu0 %v1717_v25  ;;  %v1747_v45 = vld [vmem:[%s2480_s7 + $0xe0] ss:$16 sps:$4 sm:$0xff]   ;;  %v1752_v46 = vld [vmem:[%s2480_s7 + $0xec] ss:$16 sps:$4 sm:$0xff]   ;;  %v1750_v47 = vld [vmem:[%s2480_s7 + $0xe8] ss:$16 sps:$4 sm:$0xff]  }
  0x5f   :  { %951 = vmatpush1.bf16.msra.mxu1 %v1720_v26  ;;  %911 = vmatprep.subr.bf16.mxu0 %v1725_v27  ;;  %v2296_v48 = vld [vmem:[%s2475_s2 + $0x8] sm:$0xff]  ;;  %v1755_v50 = vld [vmem:[%s2479_s6 + $0x4] ss:$16 sps:$4 sm:$0xff]   ;;  %v1753_v52 = vld [vmem:[%s2479_s6] ss:$16 sps:$4 sm:$0xff]   ;;  %v633_v26 = vlaneseq  ;;  %vm1874_vm0 = vmmov 0  }
  0x60   :  { %952 = vmatprep.subr.bf16.mxu1 %v1728_v29  ;;  %v712_v49 = vpack.c.bf16 %v2296_v48, %v2296_v48  ;;  %v1758_v51 = vld [vmem:[%s2479_s6 + $0xc] ss:$16 sps:$4 sm:$0xff]   ;;  %v1756_v53 = vld [vmem:[%s2479_s6 + $0x8] ss:$16 sps:$4 sm:$0xff]   ;;  %v1761_v54 = vld [vmem:[%s2479_s6 + $0x24] ss:$16 sps:$4 sm:$0xff]  }
  0x61   :  { %v1764_v55 = vld [vmem:[%s2479_s6 + $0x2c] ss:$16 sps:$4 sm:$0xff]   ;;  %v1759_v56 = vld [vmem:[%s2479_s6 + $0x20] ss:$16 sps:$4 sm:$0xff]   ;;  %v1762_v57 = vld [vmem:[%s2479_s6 + $0x28] ss:$16 sps:$4 sm:$0xff]  }
  0x62   :  { %912 = vmatpush1.bf16.msra.mxu0 %v1723_v28  ;;  %v1767_v58 = vld [vmem:[%s2479_s6 + $0x44] ss:$16 sps:$4 sm:$0xff]   ;;  %v1765_v59 = vld [vmem:[%s2479_s6 + $0x40] ss:$16 sps:$4 sm:$0xff]   ;;  %v1768_v60 = vld [vmem:[%s2479_s6 + $0x48] ss:$16 sps:$4 sm:$0xff]  }
  0x63   :  { %953 = vmatpush1.bf16.msra.mxu1 %v1726_v30  ;;  %913 = vmatprep.subr.bf16.mxu0 %v1731_v31  ;;  %v1773_v61 = vld [vmem:[%s2479_s6 + $0x64] ss:$16 sps:$4 sm:$0xff]   ;;  %v1776_v62 = vld [vmem:[%s2479_s6 + $0x6c] ss:$16 sps:$4 sm:$0xff]   ;;  %v1771_v63 = vld [vmem:[%s2479_s6 + $0x60] ss:$16 sps:$4 sm:$0xff]  }
  0x64   :  { %954 = vmatprep.subr.bf16.mxu1 %v1734_v34  ;;  %v1774_v0 = vld [vmem:[%s2479_s6 + $0x68] ss:$16 sps:$4 sm:$0xff]   ;;  %v1779_v1 = vld [vmem:[%s2479_s6 + $0x84] ss:$16 sps:$4 sm:$0xff]   ;;  %v1782_v3 = vld [vmem:[%s2479_s6 + $0x8c] ss:$16 sps:$4 sm:$0xff]  }
  0x65   :  { %v1777_v4 = vld [vmem:[%s2479_s6 + $0x80] ss:$16 sps:$4 sm:$0xff]   ;;  %v1780_v5 = vld [vmem:[%s2479_s6 + $0x88] ss:$16 sps:$4 sm:$0xff]   ;;  %v1785_v6 = vld [vmem:[%s2479_s6 + $0xa4] ss:$16 sps:$4 sm:$0xff]  }
  0x66   :  { %914 = vmatpush1.bf16.msra.mxu0 %v1729_v32  ;;  %v1788_v7 = vld [vmem:[%s2479_s6 + $0xac] ss:$16 sps:$4 sm:$0xff]   ;;  %v1783_v8 = vld [vmem:[%s2479_s6 + $0xa0] ss:$16 sps:$4 sm:$0xff]   ;;  %v1786_v9 = vld [vmem:[%s2479_s6 + $0xa8] ss:$16 sps:$4 sm:$0xff]  }
  0x67   :  { %955 = vmatpush1.bf16.msra.mxu1 %v1732_v35  ;;  %915 = vmatprep.subr.bf16.mxu0 %v1737_v36  ;;  %v1791_v10 = vld [vmem:[%s2479_s6 + $0xc4] ss:$16 sps:$4 sm:$0xff]   ;;  %v1794_v11 = vld [vmem:[%s2479_s6 + $0xcc] ss:$16 sps:$4 sm:$0xff]   ;;  %v1789_v12 = vld [vmem:[%s2479_s6 + $0xc0] ss:$16 sps:$4 sm:$0xff]  }
  0x68   :  { %956 = vmatprep.subr.bf16.mxu1 %v1740_v38  ;;  %v1792_v13 = vld [vmem:[%s2479_s6 + $0xc8] ss:$16 sps:$4 sm:$0xff]   ;;  %v1797_v14 = vld [vmem:[%s2479_s6 + $0xe4] ss:$16 sps:$4 sm:$0xff]   ;;  %v1800_v15 = vld [vmem:[%s2479_s6 + $0xec] ss:$16 sps:$4 sm:$0xff]  }
  0x69   :  { %v1795_v16 = vld [vmem:[%s2479_s6 + $0xe0] ss:$16 sps:$4 sm:$0xff]   ;;  %v1798_v17 = vld [vmem:[%s2479_s6 + $0xe8] ss:$16 sps:$4 sm:$0xff]   ;;  %v2398_v27 = vshrl.u32 %v633_v26, 7  ;;  %s2490_s28 = sld [smem:[#allocation9_spill]] }
  0x6a   :  { %916 = vmatpush1.bf16.msra.mxu0 %v1735_v37  ;;  %v631_v29 = vld [vmem:[%s2478_s5] sm:$0xf]  ;;  %s2491_s1 = sld [smem:[#allocation10_spill]] }
  0x6b   :  { %957 = vmatpush1.bf16.msra.mxu1 %v1738_v39  ;;  %917 = vmatprep.subr.bf16.mxu0 %v1743_v40  ;;  %v635_v28 = vsub.s32 0, %v2398_v27  ;;  %v639_v30 = vsub.s32 1, %v2398_v27 }
  0x6c   :  { %958 = vmatprep.subr.bf16.mxu1 %v1746_v42 }
  0x6d   :  { %v636_v31 = vrot.slane %v631_v29, %v635_v28  ;;  %v640_v40 = vrot.slane %v631_v29, %v639_v30 }
  0x6e   :  { %918 = vmatpush1.bf16.msra.mxu0 %v1741_v41 }
  0x6f   :  { %959 = vmatpush1.bf16.msra.mxu1 %v1744_v43  ;;  %919 = vmatprep.subr.bf16.mxu0 %v1749_v44 }
  0x70   :  { %960 = vmatprep.subr.bf16.mxu1 %v1752_v46 }
  0x72   :  { %920 = vmatpush1.bf16.msra.mxu0 %v1747_v45 }
  0x73   :  { %961 = vmatpush1.bf16.msra.mxu1 %v1750_v47  ;;  %1147 = vmatprep.subr.bf16.mxu0 %v1755_v50 }
  0x74   :  { %1188 = vmatprep.subr.bf16.mxu1 %v1758_v51 }
  0x75   :  { %938 = vmatmul.mubr.bf16.vlgmr.msra.gmra.mrb[8].mxu0 %v712_v49 }
  0x76   :  { %1179 = vmatprep.mubr.bf16.mxu0 %v1872_v2  ;;  %979 = vmatmul.mubr.bf16.vlgmr.msra.gmra.mrb[8].mxu1 %v712_v49 }
  0x77   :  { %1148 = vmatpush1.bf16.msra.mxu0 %v1753_v52  ;;  %1189 = vmatpush1.bf16.msra.mxu1 %v1756_v53  ;;  %v647_v53 = vsub.s32 3, %v2398_v27 }
  0x78   :  { %1220 = vmatprep.mubr.bf16.mxu1 %v1872_v2  ;;  %1149 = vmatprep.subr.bf16.mxu0 %v1761_v54  ;;  %v1770_v2 = vld [vmem:[%s2479_s6 + $0x4c] ss:$16 sps:$4 sm:$0xff]   ;;  %v643_v54 = vsub.s32 2, %v2398_v27 }
  0x79   :  { %1190 = vmatprep.subr.bf16.mxu1 %v1764_v55 }
  0x7b   :  { %1150 = vmatpush1.bf16.msra.mxu0 %v1759_v56  ;;  %1191 = vmatpush1.bf16.msra.mxu1 %v1762_v57  ;;  %v648_v56 = vrot.slane %v631_v29, %v647_v53  ;;  %v644_v57 = vrot.slane %v631_v29, %v643_v54 }
  0x7c   :  { %1151 = vmatprep.subr.bf16.mxu0 %v1767_v58  ;;  %1192 = vmatprep.subr.bf16.mxu1 %v1770_v2 }
  0x7f   :  { %1152 = vmatpush1.bf16.msra.mxu0 %v1765_v59  ;;  %1193 = vmatpush1.bf16.msra.mxu1 %v1768_v60 }
  0x80   :  { %1153 = vmatprep.subr.bf16.mxu0 %v1773_v61  ;;  %1194 = vmatprep.subr.bf16.mxu1 %v1776_v62 }
  0x83   :  { %1154 = vmatpush1.bf16.msra.mxu0 %v1771_v63  ;;  %1195 = vmatpush1.bf16.msra.mxu1 %v1774_v0 }
  0x84   :  { %1155 = vmatprep.subr.bf16.mxu0 %v1779_v1  ;;  %1196 = vmatprep.subr.bf16.mxu1 %v1782_v3 }
  0x87   :  { %1156 = vmatpush1.bf16.msra.mxu0 %v1777_v4  ;;  %1197 = vmatpush1.bf16.msra.mxu1 %v1780_v5 }
  0x88   :  { %1157 = vmatprep.subr.bf16.mxu0 %v1785_v6  ;;  %1198 = vmatprep.subr.bf16.mxu1 %v1788_v7 }
  0x8b   :  { %1158 = vmatpush1.bf16.msra.mxu0 %v1783_v8  ;;  %1199 = vmatpush1.bf16.msra.mxu1 %v1786_v9 }
  0x8c   :  { %1159 = vmatprep.subr.bf16.mxu0 %v1791_v10  ;;  %1200 = vmatprep.subr.bf16.mxu1 %v1794_v11 }
  0x8f   :  { %1160 = vmatpush1.bf16.msra.mxu0 %v1789_v12  ;;  %1201 = vmatpush1.bf16.msra.mxu1 %v1792_v13 }
  0x90   :  { %1161 = vmatprep.subr.bf16.mxu0 %v1797_v14  ;;  %1202 = vmatprep.subr.bf16.mxu1 %v1800_v15  ;;  %v1873_v15 = vmov 0.0  }
  0x93   :  { %1162 = vmatpush1.bf16.msra.mxu0 %v1795_v16  ;;  %1203 = vmatpush1.bf16.msra.mxu1 %v1798_v17  ;;  %v1802_v16 = vld [vmem:[%s2482_s9 + $0x8] sm:$0xff]   ;;  %v1803_v17 = vld [vmem:[%s2482_s9 + $0x10] sm:$0xff]  }
  0x94   :  { %1584 = vmatprep.subr.bf16.mxu0 %v1873_v15 }
 0x105   :  { %v341_v18 = vpop.f32.mrb[0].mxu0  ;;  %v382_v19 = vpop.f32.mrb[0].mxu1 }
 0x106   :  { %v343_v20 = vpop.f32.mrb[1].mxu0  ;;  %v384_v21 = vpop.f32.mrb[1].mxu1 }
 0x107   :  { %v345_v22 = vpop.f32.mrb[2].mxu0  ;;  %v386_v23 = vpop.f32.mrb[2].mxu1 }
 0x108   :  { %v346_v24 = vpop.f32.mrb[3].mxu0  ;;  %v387_v25 = vpop.f32.mrb[3].mxu1  ;;  %v1808_v22 = vld [vmem:[%s2482_s9 + $0x38] sm:$0xff]   ;;  %v1229_v23 = vld [vmem:[%s2490_s28] sm:$0xf] }
 0x109   :  { %v1234_v24 = vrot.slane %v1229_v23, %v635_v28 }
 0x125   :  { %v583_v32 = vpop.f32.mrb[4].mxu0  ;;  %v624_v34 = vpop.f32.mrb[4].mxu1 }
 0x126   :  { %v584_v35 = vadd.f32 %v583_v32, %v341_v18  ;;  %v625_v36 = vadd.f32 %v624_v34, %v382_v19  ;;  %v585_v37 = vpop.f32.mrb[5].mxu0  ;;  %v626_v38 = vpop.f32.mrb[5].mxu1  ;;  %v1804_v18 = vld [vmem:[%s2482_s9 + $0x18] sm:$0xff]   ;;  %v1805_v19 = vld [vmem:[%s2482_s9 + $0x20] sm:$0xff]  }
 0x127   :  { %v586_v39 = vadd.f32 %v585_v37, %v343_v20  ;;  %v627_v41 = vadd.f32 %v626_v38, %v384_v21  ;;  %v587_v42 = vpop.f32.mrb[6].mxu0  ;;  %v628_v43 = vpop.f32.mrb[6].mxu1  ;;  %v1806_v20 = vld [vmem:[%s2482_s9 + $0x28] sm:$0xff]   ;;  %v1807_v21 = vld [vmem:[%s2482_s9 + $0x30] sm:$0xff]  }
 0x128   :  { %v653_v44 = vadd.f32 %v636_v31, %v584_v35  ;;  %v588_v45 = vpop.f32.mrb[7].mxu0  ;;  %v629_v46 = vpop.f32.mrb[7].mxu1  ;;  %v655_v60 = vadd.f32 %v644_v57, %v625_v36  ;;  %v1238_v36 = vrot.slane %v1229_v23, %v639_v30  ;;  %v1242_v30 = vrot.slane %v1229_v23, %v643_v54 }
 0x129   :  { %v654_v49 = vadd.f32 %v640_v40, %v586_v39  ;;  %v656_v2 = vadd.f32 %v648_v56, %v627_v41 }
 0x12a   :  { %v1496_v47 = vmul.f32 -1.442695, %v653_v44 }
 0x12b   :  { %v1497_v50 = vmul.f32 -1.442695, %v654_v49  ;;  %v1246_v49 = vrot.slane %v1229_v23, %v647_v53  ;;  %v1566_v53 = vld [vmem:[%s2491_s1] ss:$0 sm:$0xff] }
 0x12c   :  { %1809 = vpow2.f32 %v1496_v47 }
 0x12d   :  { %1811 = vpow2.f32 %v1497_v50 }
 0x136   :  { %v1810_v51 = vpop.eup %1809 }
 0x137   :  { %v660_v52 = vadd.f32 1.0, %v1810_v51  ;;  %v1812_v55 = vpop.eup %1811 }
 0x138   :  { %v666_v58 = vadd.f32 1.0, %v1812_v55 }
 0x139   :  { %1813 = vrcp.f32 %v660_v52 }
 0x13a   :  { %1815 = vrcp.f32 %v666_v58 }
 0x143   :  { %v1814_v59 = vpop.eup %1813 }
 0x144   :  { %v669_v61 = vmul.f32 %v1814_v59, %v656_v2  ;;  %v1816_v63 = vpop.eup %1815 }
 0x145   :  { %v672_v0 = vsub.f32 1.0, %v1816_v63  ;;  %v674_v4 = vmul.f32 %v1816_v63, %v2047_v33  ;;  %v1801_v33 = vld [vmem:[%s2482_s9] sm:$0xff]  }
 0x146   :  { %v670_v62 = vadd.f32 %v669_v61, %v655_v60 }
 0x148   :  { %1817 = vtanh.f32 %v670_v62  ;;  %v939_v7 = vpop.f32.mrb[8].mxu0 }
 0x149   :  { %v941_v8 = vpop.f32.mrb[9].mxu0  ;;  %v980_v11 = vpop.f32.mrb[8].mxu1 }
 0x14a   :  { %v943_v9 = vpop.f32.mrb[10].mxu0  ;;  %v982_v12 = vpop.f32.mrb[9].mxu1 }
 0x14b   :  { %v944_v10 = vpop.f32.mrb[11].mxu0  ;;  %v984_v13 = vpop.f32.mrb[10].mxu1 }
 0x14c   :  { %v985_v14 = vpop.f32.mrb[11].mxu1 }
 0x152   :  { %v1818_v1 = vpop.eup %1817 }
 0x153   :  { %v673_v3 = vmul.f32 %v1818_v1, %v672_v0 }
 0x155   :  { %v675_v5 = vadd.f32 %v674_v4, %v673_v3 }
 0x157   :  { %676 = vst [vmem:[%s2485_s12] sm:$0xff] %v675_v5  ;;  %v677_v6 = vpack.c.bf16 %v675_v5, %v675_v5 }
 0x159   :  { %1180 = vmatmul.mubr.bf16.vlgmr.msra.gmra.mrb[12].mxu0 %v677_v6  ;;  %1221 = vmatmul.mubr.bf16.vlgmr.msra.gmra.mrb[12].mxu1 %v677_v6 }
 0x15a   :  { %1585 = vmatpush3.bf16.msra.mxu0 %v1801_v33  ;;  %1600 = vmatprep.mubr.msk.bf16.mxu0 %vm1874_vm0, %v1873_v15 }
 0x15b   :  { %1586 = vmatprep.subr.bf16.mxu0 %v1873_v15 }
 0x15e   :  { %1587 = vmatpush3.bf16.msra.mxu0 %v1802_v16 }
 0x15f   :  { %1588 = vmatprep.subr.bf16.mxu0 %v1873_v15 }
 0x162   :  { %1589 = vmatpush3.bf16.msra.mxu0 %v1803_v17 }
 0x163   :  { %1590 = vmatprep.subr.bf16.mxu0 %v1873_v15 }
 0x166   :  { %1591 = vmatpush3.bf16.msra.mxu0 %v1804_v18 }
 0x167   :  { %1592 = vmatprep.subr.bf16.mxu0 %v1873_v15 }
 0x16a   :  { %1593 = vmatpush3.bf16.msra.mxu0 %v1805_v19 }
 0x16b   :  { %1594 = vmatprep.subr.bf16.mxu0 %v1873_v15 }
 0x16e   :  { %1595 = vmatpush3.bf16.msra.mxu0 %v1806_v20 }
 0x16f   :  { %1596 = vmatprep.subr.bf16.mxu0 %v1873_v15 }
 0x172   :  { %1597 = vmatpush3.bf16.msra.mxu0 %v1807_v21 }
 0x173   :  { %1598 = vmatprep.subr.bf16.mxu0 %v1873_v15 }
 0x176   :  { %1599 = vmatpush3.bf16.msra.mxu0 %v1808_v22 }
 0x22c   :  { %v1181_v25 = vpop.f32.mrb[12].mxu0  ;;  %v1222_v26 = vpop.f32.mrb[12].mxu1 }
 0x22d   :  { %v1182_v29 = vadd.f32 %v1181_v25, %v939_v7  ;;  %v1223_v31 = vadd.f32 %v1222_v26, %v980_v11  ;;  %v1183_v32 = vpop.f32.mrb[13].mxu0  ;;  %v1224_v34 = vpop.f32.mrb[13].mxu1 }
 0x22e   :  { %v1184_v35 = vadd.f32 %v1183_v32, %v941_v8  ;;  %v1225_v37 = vadd.f32 %v1224_v34, %v982_v12  ;;  %v1185_v38 = vpop.f32.mrb[14].mxu0  ;;  %v1226_v39 = vpop.f32.mrb[14].mxu1 }
 0x22f   :  { %v1251_v40 = vadd.f32 %v1234_v24, %v1182_v29  ;;  %v1186_v41 = vpop.f32.mrb[15].mxu0  ;;  %v1227_v42 = vpop.f32.mrb[15].mxu1  ;;  %v1253_v55 = vadd.f32 %v1242_v30, %v1223_v31 }
 0x230   :  { %v1252_v44 = vadd.f32 %v1238_v36, %v1184_v35  ;;  %v1254_v51 = vadd.f32 %v1246_v49, %v1225_v37 }
 0x231   :  { %v1563_v43 = vmul.f32 -1.442695, %v1251_v40 }
 0x232   :  { %v1564_v28 = vmul.f32 -1.442695, %v1252_v44 }
 0x233   :  { %1819 = vpow2.f32 %v1563_v43 }
 0x234   :  { %1821 = vpow2.f32 %v1564_v28 }
 0x23d   :  { %v1820_v45 = vpop.eup %1819 }
 0x23e   :  { %v1258_v46 = vadd.f32 1.0, %v1820_v45  ;;  %v1822_v47 = vpop.eup %1821 }
 0x23f   :  { %v1264_v50 = vadd.f32 1.0, %v1822_v47 }
 0x240   :  { %1823 = vrcp.f32 %v1258_v46 }
 0x241   :  { %1825 = vrcp.f32 %v1264_v50 }
 0x24a   :  { %v1824_v52 = vpop.eup %1823 }
 0x24b   :  { %v1267_v56 = vmul.f32 %v1824_v52, %v1254_v51  ;;  %v1826_v58 = vpop.eup %1825 }
 0x24c   :  { %v1270_v2 = vsub.f32 1.0, %v1826_v58  ;;  %v1272_v61 = vmul.f32 %v1826_v58, %v2296_v48 }
 0x24d   :  { %v1268_v57 = vadd.f32 %v1267_v56, %v1253_v55 }
 0x24f   :  { %1827 = vtanh.f32 %v1268_v57 }
 0x259   :  { %v1828_v59 = vpop.eup %1827 }
 0x25a   :  { %v1271_v60 = vmul.f32 %v1828_v59, %v1270_v2 }
 0x25c   :  { %v1273_v62 = vadd.f32 %v1272_v61, %v1271_v60 }
 0x25e   :  { %1565 = vst [vmem:[%s2485_s12 + $0x8] sm:$0xff] %v1273_v62  ;;  %v1276_v27 = vpack.c.bf16 %v1273_v62, %v1273_v62  ;;  %s1875_s12 = smov [#allocation5]  }
 0x25f   :  { %s1405_s8 = sshll.u32 %s1875_s12, 4  ;;  %s1406_s8 = int_to_ptr.vmem [resolvable:$true] %s1405_s8 }
 0x260   :  { %1601 = vmatmul.mubr.bf16.vlgmr.msra.gmra.mrb[16].mxu0 %v1276_v27  ;;  %s1845_s10 = scalar_lea.vmem %s1406_s8, 128  ;;  %p1850_p6 = scmp.lt.s32.totalorder %s1406_s8, %s1406_s8 }
 0x261   :  { %p1846_p5 = scmp.ne.s32.totalorder %s1406_s8, %s1845_s10  ;;  %p1851_p7 = scmp.lt.s32.totalorder %s1845_s10, %s1845_s10 }
 0x263   :  { %p1852_p8 = por %p1851_p7, %p1850_p6 }
 0x265   :  { %p1853_p9 = pnand %p1852_p8, %p1846_p5 }
 0x333   :  { %v1382_v54 = vpop.f32.mrb[16].mxu0 }
 0x334   :  { %v1383_v63 = vadd.f32 %v1566_v53, %v1382_v54  ;;  %v1602_v0 = vpop.f32.mrb[17].mxu0 }
 0x335   :  { %v1385_v1 = vpop.f32.mrb[18].mxu0 }
 0x336   :  { %1388 = vmax.xlane.f32.xlu0 %v1383_v63  ;;  %v1603_v3 = vpop.f32.mrb[19].mxu0 }
 0x3c3   :  { %v1389_v4 = vpop.xlane.xlu0 %1388 }
 0x3c4   :  { %v1390_v5 = vsub.f32 %v1383_v63, %v1389_v4 }
 0x3c6   :  { %v1391_v48 = vmul.f32 1.442695, %v1390_v5 }
 0x3c8   :  { %1829 = vpow2.f32 %v1391_v48 }
 0x3d2   :  { %v1830_v6 = vpop.eup %1829 }
 0x3d3   :  { %1393 = vadd.xlane.f32.xlu0 %v1830_v6 }
 0x460   :  { %v1394_v7 = vpop.xlane.xlu0 %1393 }
 0x461   :  { %1831 = vlog2.f32 %v1394_v7 }
 0x46b   :  { %v1832_v8 = vpop.eup %1831 }
 0x46c   :  { %v1396_v9 = vmul.f32 0.6931472, %v1832_v8 }
 0x46e   :  { %v1397_v10 = vsub.f32 %v1390_v5, %v1396_v9 }
 0x470   :  { %1398 = vst [vmem:[#allocation5] sm:$0xff] %v1397_v10 }
 0x471   :  { %1856 = shalt.err (!%p1853_p9)
}
 0x472   :  { %s2492_s5 = sld [smem:[#allocation11_spill]] }
 0x478   :  { %s1857_s6 = scalar_lea.hbm %s2492_s5, 128 }
 0x479   :  { %p1858_p10 = scmp.ne.s32.totalorder %s2492_s5, %s1857_s6  ;;  %p1861_p11 = scmp.lt.u32.totalorder %s1857_s6, %s2492_s5 }
 0x47b   :  { %p1863_p12 = pnand %p1861_p11, %p1858_p10 }
 0x47d   :  { %1866 = shalt.err (!%p1863_p12)
}
 0x47e   :  { %1408 = dma.vmem_to_hbm [thread:$0]  %s1406_s8, 128, %s2492_s5, [#allocation6]  }
 0x47f   :  { %1869 = dma.done.wait [#allocation6], 128  }
 0x480   :  { %1870 = vsyncadd [#allocation6], 4294967168 }
 0x481   :  { %1416 = vsyncpa [#allocation6], 1 }

</bundles_post_ra>
